<compile_context>
chip_gen: v5e
topology: v5e:2x2
jax: 0.10.0
libtpu: 0.0.40
codegen_flags: <defaults>
</compile_context>

<pallas_src>
import jax
import jax.numpy as jnp
from jax.experimental import pallas as pl
from jax.experimental.pallas import tpu as pltpu


def _round_up(x, m):
    return ((x + m - 1) // m) * m


def _attn_decoder_step_kernel(
    # ---- per-step / resident inputs ----
    emb_ref,      # (1, B, H)  bf16  embedded token rows for this step
    h0_ref,       # (B, H)     f32   initial hidden (layer 0), DMA'd once
    enc_ref,      # (B, H, Mp) bf16  encoder outputs, transposed + M padded, DMA'd once
    attn_w_ref,   # (2H, Mp)   bf16  fused attn weight for cat(emb, h)
    attn_b_ref,   # (1, Mp)    f32   padding lanes = -1e30
    comb_w_ref,   # (2H, H)    bf16  fused attn_combine weight for cat(emb, applied)
    comb_b_ref,   # (1, H)     f32
    gru_w_ref,    # (2H, 4H)   bf16  fused GRU block matrix -> [r_sum|z_sum|i_n|h_n]
    gru_b_ref,    # (1, 4H)    f32   [b_ir+b_hr | b_iz+b_hz | b_in | b_hn]
    out_w_ref,    # (H, Op)    bf16
    out_b_ref,    # (1, Op)    f32   padding lanes = -1e30
    # ---- outputs ----
    logp_ref,     # (1, B, Op) f32   per-step log-probs (lane-dense, sliced by wrapper)
    hnew_ref,     # (B, H)     f32   final hidden, written once at the last step
    attnw_ref,    # (1, B, Mp) f32   per-step attention weights (lane-dense)
    # ---- scratch ----
    h_sc,         # (B, H)     f32   VMEM-resident carried hidden state
):
    H = h0_ref.shape[-1]
    t = pl.program_id(0)

    # Seed the carried hidden state from the caller-provided hidden on step 0.
    @pl.when(t == 0)
    def _():
        h_sc[...] = h0_ref[...]

    h = h_sc[...]                                   # (B, H) f32 — previous hidden
    h16 = h.astype(jnp.bfloat16)
    emb16 = emb_ref[0]                              # (B, H) bf16

    # ---- attention logits: [emb | h] @ W_attn, as two K=H dots (no lane concat) ----
    logits = (
        jnp.dot(emb16, attn_w_ref[0:H, :], preferred_element_type=jnp.float32)
        + jnp.dot(h16, attn_w_ref[H:, :], preferred_element_type=jnp.float32)
        + attn_b_ref[...]
    )                                               # (B, Mp) f32; pad lanes ~ -1e30
    lmax = jnp.max(logits, axis=-1, keepdims=True)
    e = jnp.exp(logits - lmax)                      # pad lanes -> exactly 0
    attn_w = e * pl.reciprocal(jnp.sum(e, axis=-1, keepdims=True), approx=True)
    attnw_ref[0] = attn_w                           # lane-dense (B, Mp) store

    # ---- attn_applied[b,h] = sum_m attn_w[b,m] * enc[b,m,h] ----
    # enc is pre-transposed to (B, H, Mp): bf16 VPU multiply, f32 lane reduce.
    prod = attn_w.astype(jnp.bfloat16)[:, None, :] * enc_ref[...]       # (B, H, Mp)
    attn_applied = jnp.sum(prod.astype(jnp.float32), axis=-1)           # (B, H) f32

    # ---- attn_combine + relu (two K=H dots, no lane concat) ----
    x = (
        jnp.dot(emb16, comb_w_ref[0:H, :], preferred_element_type=jnp.float32)
        + jnp.dot(attn_applied.astype(jnp.bfloat16), comb_w_ref[H:, :],
                  preferred_element_type=jnp.float32)
        + comb_b_ref[...]
    )
    x = jnp.maximum(x, 0.0)                                             # (B, H)

    # ---- fused GRU cell: [x | h] @ block matrix, gates ordered r,z,n ----
    g = (
        jnp.dot(x.astype(jnp.bfloat16), gru_w_ref[0:H, :],
                preferred_element_type=jnp.float32)
        + jnp.dot(h16, gru_w_ref[H:, :], preferred_element_type=jnp.float32)
        + gru_b_ref[...]
    )                                                                   # (B, 4H)
    rz = jax.nn.sigmoid(g[:, 0:2 * H])
    r = rz[:, 0:H]
    z = rz[:, H:2 * H]
    n = jnp.tanh(g[:, 2 * H:3 * H] + r * g[:, 3 * H:4 * H])
    h_new = (1.0 - z) * n + z * h
    h_sc[...] = h_new                               # carried in VMEM across steps

    @pl.when(t == pl.num_programs(0) - 1)
    def _():
        hnew_ref[...] = h_new                       # single HBM writeback at the end

    # ---- output head + log_softmax over the (padded) last dim ----
    o = (
        jnp.dot(h_new.astype(jnp.bfloat16), out_w_ref[...],
                preferred_element_type=jnp.float32)
        + out_b_ref[...]
    )                                               # pad lanes ~ -1e30 -> exp == 0
    omax = jnp.max(o, axis=-1, keepdims=True)
    lse = jnp.log(jnp.sum(jnp.exp(o - omax), axis=-1, keepdims=True)) + omax
    logp_ref[0] = o - lse                           # lane-dense (B, Op) store


def prepare_params(params):
    """One-time weight preprocessing: transpose to (in, out), fuse the cat-linear
    halves and GRU gate matrices, pad the M / O lane dims to 128 (bias padding
    = -1e30 so softmax / log-softmax ignore the pad lanes), cast MXU operands
    to bf16.  Call ONCE; reuse the result for every decode call."""
    H = params["comb_w"].shape[0]
    M = params["attn_w"].shape[0]
    O = params["out_w"].shape[0]
    Mp = _round_up(M, 128)
    Op = _round_up(O, 128)
    wdt = jnp.bfloat16
    NEG = -1e30

    # attn / attn_combine: PyTorch (out, in) -> (in, out); rows 0:H act on emb,
    # rows H:2H act on the second half of the cat() input.
    attn_w = jnp.asarray(params["attn_w"], jnp.float32).T               # (2H, M)
    attn_w = jnp.pad(attn_w, ((0, 0), (0, Mp - M))).astype(wdt)         # (2H, Mp)
    attn_b = jnp.pad(jnp.asarray(params["attn_b"], jnp.float32),
                     (0, Mp - M), constant_values=NEG).reshape(1, Mp)

    comb_w = jnp.asarray(params["comb_w"], jnp.float32).T.astype(wdt)   # (2H, H)
    comb_b = jnp.asarray(params["comb_b"], jnp.float32).reshape(1, H)

    # GRU: block matrix so [x | h] @ W yields [i_r+h_r | i_z+h_z | i_n | h_n].
    w_ih = jnp.asarray(params["gru_w_ih"], jnp.float32)                 # (3H, H) rows r,z,n
    w_hh = jnp.asarray(params["gru_w_hh"], jnp.float32)                 # (3H, H)
    zero = jnp.zeros((H, H), jnp.float32)
    top = jnp.concatenate(                                              # rows for x
        [w_ih[0:H].T, w_ih[H:2 * H].T, w_ih[2 * H:3 * H].T, zero], axis=1)
    bot = jnp.concatenate(                                              # rows for h
        [w_hh[0:H].T, w_hh[H:2 * H].T, zero, w_hh[2 * H:3 * H].T], axis=1)
    gru_w = jnp.concatenate([top, bot], axis=0).astype(wdt)             # (2H, 4H)

    b_ih = jnp.asarray(params["gru_b_ih"], jnp.float32)
    b_hh = jnp.asarray(params["gru_b_hh"], jnp.float32)
    gru_b = jnp.concatenate(
        [b_ih[0:H] + b_hh[0:H], b_ih[H:2 * H] + b_hh[H:2 * H],
         b_ih[2 * H:3 * H], b_hh[2 * H:3 * H]]
    ).reshape(1, 4 * H)

    out_w = jnp.asarray(params["out_w"], jnp.float32).T                 # (H, O)
    out_w = jnp.pad(out_w, ((0, 0), (0, Op - O))).astype(wdt)           # (H, Op)
    out_b = jnp.pad(jnp.asarray(params["out_b"], jnp.float32),
                    (0, Op - O), constant_values=NEG).reshape(1, Op)

    return {
        "embedding": jnp.asarray(params["embedding"], jnp.float32),     # (O, H)
        "attn_w": attn_w, "attn_b": attn_b,
        "comb_w": comb_w, "comb_b": comb_b,
        "gru_w": gru_w, "gru_b": gru_b,
        "out_w": out_w, "out_b": out_b,
    }


def _nbytes(x):
    return int(x.size) * x.dtype.itemsize


@jax.jit
def attn_decoder_decode(input_ids, hidden, encoder_outputs, kp):
    """Run T decode steps in ONE pallas_call.

    input_ids: (T, B) int32 tokens (teacher-forced), hidden: (1, B, H),
    encoder_outputs: (B, M, H).
    Returns (logp (T,B,O), hidden (1,B,H), attn_weights (T,B,M))."""
    T, B = input_ids.shape
    H = hidden.shape[-1]
    M = encoder_outputs.shape[1]
    O = kp["embedding"].shape[0]
    Mp = kp["attn_w"].shape[1]
    Op = kp["out_w"].shape[1]

    # Glue done once in XLA per call (covers all T steps):
    #   embedding gather (table stays in HBM; v7x-VMEM friendly), dropout = identity,
    #   encoder transpose/pad to a lane-dense bf16 slab.
    embedded = kp["embedding"][input_ids].reshape(T, B, H).astype(jnp.bfloat16)
    h0 = hidden[0].astype(jnp.float32)
    enc_t = jnp.swapaxes(encoder_outputs, 1, 2).astype(jnp.bfloat16)    # (B, H, M)
    enc_t = jnp.pad(enc_t, ((0, 0), (0, 0), (0, Mp - M)))               # (B, H, Mp)

    const2 = lambda t: (0, 0)
    const3 = lambda t: (0, 0, 0)
    step3 = lambda t: (t, 0, 0)

    in_specs = [
        pl.BlockSpec((1, B, H), step3),        # embedded (streamed per step)
        pl.BlockSpec((B, H), const2),          # h0             (DMA'd once)
        pl.BlockSpec((B, H, Mp), const3),      # enc_t          (DMA'd once)
        pl.BlockSpec((2 * H, Mp), const2),     # attn_w
        pl.BlockSpec((1, Mp), const2),         # attn_b
        pl.BlockSpec((2 * H, H), const2),      # comb_w
        pl.BlockSpec((1, H), const2),          # comb_b
        pl.BlockSpec((2 * H, 4 * H), const2),  # gru_w
        pl.BlockSpec((1, 4 * H), const2),      # gru_b
        pl.BlockSpec((H, Op), const2),         # out_w
        pl.BlockSpec((1, Op), const2),         # out_b
    ]
    out_specs = [
        pl.BlockSpec((1, B, Op), step3),       # logp  per step
        pl.BlockSpec((B, H), const2),          # final hidden
        pl.BlockSpec((1, B, Mp), step3),       # attn weights per step
    ]
    out_shapes = (
        jax.ShapeDtypeStruct((T, B, Op), jnp.float32),
        jax.ShapeDtypeStruct((B, H), jnp.float32),
        jax.ShapeDtypeStruct((T, B, Mp), jnp.float32),
    )

    # Advisory cost estimate so XLA schedules around this tiny custom call.
    flops_per_step = 2 * B * (2 * H * Mp + H * Mp + 2 * H * H + 2 * H * 4 * H + H * Op)
    bytes_fixed = sum(_nbytes(a) for a in (
        h0, enc_t, kp["attn_w"], kp["attn_b"], kp["comb_w"], kp["comb_b"],
        kp["gru_w"], kp["gru_b"], kp["out_w"], kp["out_b"])) + B * H * 4
    bytes_per_step = B * H * 2 + B * Op * 4 + B * Mp * 4
    cost = pl.CostEstimate(
        flops=T * flops_per_step,
        transcendentals=T * B * (Mp + Op + 3 * H),
        bytes_accessed=bytes_fixed + T * bytes_per_step,
    )

    logp_p, h_new, attnw_p = pl.pallas_call(
        _attn_decoder_step_kernel,
        out_shape=out_shapes,
        grid_spec=pltpu.PrefetchScalarGridSpec(
            num_scalar_prefetch=0,
            grid=(T,),
            in_specs=in_specs,
            out_specs=out_specs,
            scratch_shapes=[pltpu.VMEM((B, H), jnp.float32)],   # carried hidden
        ),
        compiler_params=pltpu.CompilerParams(
            dimension_semantics=("arbitrary",)),                # sequential in T
        cost_estimate=cost,
    )(
        embedded, h0, enc_t,
        kp["attn_w"], kp["attn_b"],
        kp["comb_w"], kp["comb_b"],
        kp["gru_w"], kp["gru_b"],
        kp["out_w"], kp["out_b"],
    )

    # Slice the lane-padded outputs back to the module's M / O.
    return logp_p[:, :, :O], h_new[None, :, :], attnw_p[:, :, :M]


def attn_decoder_forward(input_ids, hidden, encoder_outputs, kp):
    """Single-step forward matching AttnDecoderRNN.forward's signature:
    input_ids (B,), hidden (1,B,H), encoder_outputs (B,M,H)."""
    logp, h_new, attn_w = attn_decoder_decode(
        input_ids[None, :], hidden, encoder_outputs, kp)
    return logp[0], h_new, attn_w[0]


def init_params(key, hidden_size, output_size, max_length):
    """Deterministic synthetic parameters with the module's shapes (nlayers=1)."""
    H, O, M = hidden_size, output_size, max_length
    ks = jax.random.split(key, 12)
    s = 0.1
    return {
        "embedding": s * jax.random.normal(ks[0], (O, H), jnp.float32),
        "attn_w":    s * jax.random.normal(ks[1], (M, 2 * H), jnp.float32),
        "attn_b":    s * jax.random.normal(ks[2], (M,), jnp.float32),
        "comb_w":    s * jax.random.normal(ks[3], (H, 2 * H), jnp.float32),
        "comb_b":    s * jax.random.normal(ks[4], (H,), jnp.float32),
        "gru_w_ih":  s * jax.random.normal(ks[5], (3 * H, H), jnp.float32),
        "gru_w_hh":  s * jax.random.normal(ks[6], (3 * H, H), jnp.float32),
        "gru_b_ih":  s * jax.random.normal(ks[7], (3 * H,), jnp.float32),
        "gru_b_hh":  s * jax.random.normal(ks[8], (3 * H,), jnp.float32),
        "out_w":     s * jax.random.normal(ks[9], (O, H), jnp.float32),
        "out_b":     s * jax.random.normal(ks[10], (O,), jnp.float32),
    }


def _reference_decode(input_ids, hidden, encoder_outputs, params):
    """Pure-JAX f32 reference: T applications of the PyTorch module forward."""
    H = params["comb_w"].shape[0]
    emb_tab = params["embedding"]
    h = hidden[0]
    logps, attws = [], []
    for t in range(input_ids.shape[0]):
        emb = emb_tab[input_ids[t]]                                     # (B, H)
        aw = jax.nn.softmax(
            jnp.concatenate([emb, h], axis=1) @ params["attn_w"].T + params["attn_b"],
            axis=1)                                                     # (B, M)
        applied = jnp.einsum("bm,bmh->bh", aw, encoder_outputs)
        x = jax.nn.relu(
            jnp.concatenate([emb, applied], axis=1) @ params["comb_w"].T
            + params["comb_b"])
        gi = x @ params["gru_w_ih"].T + params["gru_b_ih"]
        gh = h @ params["gru_w_hh"].T + params["gru_b_hh"]
        r = jax.nn.sigmoid(gi[:, :H] + gh[:, :H])
        z = jax.nn.sigmoid(gi[:, H:2 * H] + gh[:, H:2 * H])
        n = jnp.tanh(gi[:, 2 * H:] + r * gh[:, 2 * H:])
        h = (1.0 - z) * n + z * h
        logps.append(jax.nn.log_softmax(h @ params["out_w"].T + params["out_b"], axis=1))
        attws.append(aw)
    return jnp.stack(logps), h[None], jnp.stack(attws)


if __name__ == "__main__":
    B, H, O, M, T = 8, 32, 16, 8, 6   # batch, hidden, output/vocab, max_length, steps

    key = jax.random.PRNGKey(0)
    k_in, k_h, k_enc, k_p = jax.random.split(key, 4)

    params = init_params(k_p, H, O, M)
    kparams = prepare_params(params)            # one-time weight prep (hoisted)

    input_ids = jax.random.randint(k_in, (T, B), 0, O, dtype=jnp.int32)
    hidden = jax.random.normal(k_h, (1, B, H), jnp.float32)
    encoder_outputs = jax.random.normal(k_enc, (B, M, H), jnp.float32)

    # Multi-step fused decode (main path).
    logp, hidden_new, attn_w = attn_decoder_decode(
        input_ids, hidden, encoder_outputs, kparams)
    jax.block_until_ready((logp, hidden_new, attn_w))

    assert logp.shape == (T, B, O)
    assert hidden_new.shape == (1, B, H)
    assert attn_w.shape == (T, B, M)
    assert bool(jnp.all(jnp.isfinite(logp)))
    assert bool(jnp.all(jnp.isfinite(hidden_new)))
    assert bool(jnp.all(jnp.isfinite(attn_w)))

    # Parity vs pure-f32 reference (bf16 MXU operands + approx reciprocal =>
    # expect agreement to ~1e-2; use a loose 1e-1 bound).
    r_logp, r_h, r_aw = _reference_decode(input_ids, hidden, encoder_outputs, params)
    assert float(jnp.max(jnp.abs(logp - r_logp))) < 1e-1
    assert float(jnp.max(jnp.abs(hidden_new - r_h))) < 1e-1
    assert float(jnp.max(jnp.abs(attn_w - r_aw))) < 1e-1

    # Single-step form matching the module's forward() signature.
    logp1, h1, aw1 = attn_decoder_forward(input_ids[0], hidden, encoder_outputs, kparams)
    jax.block_until_ready((logp1, h1, aw1))
    assert logp1.shape == (B, O) and h1.shape == (1, B, H) and aw1.shape == (B, M)
    assert bool(jnp.all(jnp.isfinite(logp1)))

    print("KERNEL_OK")
</pallas_src>

<mosaic_0001>
module attributes {stable_mosaic.version = 11 : i64} {
  func.func @_attn_decoder_step_kernel(%arg0: i32, %arg1: memref<1x8x32xbf16, #tpu.memory_space<vmem>>, %arg2: memref<8x32xf32, #tpu.memory_space<vmem>>, %arg3: memref<8x32x128xbf16, #tpu.memory_space<vmem>>, %arg4: memref<64x128xbf16, #tpu.memory_space<vmem>>, %arg5: memref<1x128xf32, #tpu.memory_space<vmem>>, %arg6: memref<64x32xbf16, #tpu.memory_space<vmem>>, %arg7: memref<1x32xf32, #tpu.memory_space<vmem>>, %arg8: memref<64x128xbf16, #tpu.memory_space<vmem>>, %arg9: memref<1x128xf32, #tpu.memory_space<vmem>>, %arg10: memref<32x128xbf16, #tpu.memory_space<vmem>>, %arg11: memref<1x128xf32, #tpu.memory_space<vmem>>, %arg12: memref<1x8x128xf32, #tpu.memory_space<vmem>>, %arg13: memref<8x32xf32, #tpu.memory_space<vmem>>, %arg14: memref<1x8x128xf32, #tpu.memory_space<vmem>>, %arg15: memref<8x32xf32, #tpu.memory_space<vmem>>) attributes {dimension_semantics = [#tpu.dimension_semantics<arbitrary>], iteration_bounds = array<i64: 6>, scalar_prefetch = 0 : i64, scratch_operands = 1 : i64, tpu.core_type = #tpu.core_type<tc>, window_params = [{transform_indices = @transform_0, window_bounds = array<i64: 1, 8, 32>}, {pipeline_mode = #tpu.pipeline_mode<synchronous>, transform_indices = @transform_1, window_bounds = array<i64: 8, 32>}, {pipeline_mode = #tpu.pipeline_mode<synchronous>, transform_indices = @transform_2, window_bounds = array<i64: 8, 32, 128>}, {pipeline_mode = #tpu.pipeline_mode<synchronous>, transform_indices = @transform_3, window_bounds = array<i64: 64, 128>}, {pipeline_mode = #tpu.pipeline_mode<synchronous>, transform_indices = @transform_4, window_bounds = array<i64: 1, 128>}, {pipeline_mode = #tpu.pipeline_mode<synchronous>, transform_indices = @transform_5, window_bounds = array<i64: 64, 32>}, {pipeline_mode = #tpu.pipeline_mode<synchronous>, transform_indices = @transform_6, window_bounds = array<i64: 1, 32>}, {pipeline_mode = #tpu.pipeline_mode<synchronous>, transform_indices = @transform_7, window_bounds = array<i64: 64, 128>}, {pipeline_mode = #tpu.pipeline_mode<synchronous>, transform_indices = @transform_8, window_bounds = array<i64: 1, 128>}, {pipeline_mode = #tpu.pipeline_mode<synchronous>, transform_indices = @transform_9, window_bounds = array<i64: 32, 128>}, {pipeline_mode = #tpu.pipeline_mode<synchronous>, transform_indices = @transform_10, window_bounds = array<i64: 1, 128>}, {transform_indices = @transform_11, window_bounds = array<i64: 1, 8, 128>}, {pipeline_mode = #tpu.pipeline_mode<synchronous>, transform_indices = @transform_12, window_bounds = array<i64: 8, 32>}, {transform_indices = @transform_13, window_bounds = array<i64: 1, 8, 128>}]} {
    %c0_i32 = arith.constant 0 : i32
    %0 = arith.cmpi eq, %arg0, %c0_i32 : i32
    %1 = arith.extui %0 : i1 to i32
    %c0_i32_0 = arith.constant 0 : i32
    %2 = arith.cmpi ne, %1, %c0_i32_0 : i32
    scf.if %2 {
      %c0_52 = arith.constant 0 : index
      %c0_53 = arith.constant 0 : index
      %97 = vector.load %arg2[%c0_52, %c0_53] : memref<8x32xf32, #tpu.memory_space<vmem>>, vector<8x32xf32>
      %c0_54 = arith.constant 0 : index
      %c0_55 = arith.constant 0 : index
      %98 = vector.load %arg15[%c0_54, %c0_55] : memref<8x32xf32, #tpu.memory_space<vmem>>, vector<8x32xf32>
      tpu.vector_store %arg15[%c0_54, %c0_55], %97 {strides = array<i32>} : memref<8x32xf32, #tpu.memory_space<vmem>>, vector<8x32xf32>,
    } else {
    }
    %c0 = arith.constant 0 : index
    %c0_1 = arith.constant 0 : index
    %3 = vector.load %arg15[%c0, %c0_1] : memref<8x32xf32, #tpu.memory_space<vmem>>, vector<8x32xf32>
    %4 = arith.truncf %3 : vector<8x32xf32> to vector<8x32xbf16>
    %c0_2 = arith.constant 0 : index
    %c0_3 = arith.constant 0 : index
    %c0_4 = arith.constant 0 : index
    %5 = vector.load %arg1[%c0_2, %c0_3, %c0_4] : memref<1x8x32xbf16, #tpu.memory_space<vmem>>, vector<1x8x32xbf16>
    %6 = vector.shape_cast %5 : vector<1x8x32xbf16> to vector<8x32xbf16>
    %c0_5 = arith.constant 0 : index
    %c0_6 = arith.constant 0 : index
    %7 = vector.load %arg4[%c0_5, %c0_6] : memref<64x128xbf16, #tpu.memory_space<vmem>>, vector<32x128xbf16>
    %cst = arith.constant dense<0.000000e+00> : vector<8x128xf32>
    %8 = tpu.matmul %6, %7, %cst {dimension_numbers = #tpu.dot_dimension_numbers<[1], [0], [0], [1], [0, 0, 1, 1], [], []>} : vector<8x32xbf16>, vector<32x128xbf16>, vector<8x128xf32> -> vector<8x128xf32>
    %c32 = arith.constant 32 : index
    %c0_7 = arith.constant 0 : index
    %9 = vector.load %arg4[%c32, %c0_7] : memref<64x128xbf16, #tpu.memory_space<vmem>>, vector<32x128xbf16>
    %cst_8 = arith.constant dense<0.000000e+00> : vector<8x128xf32>
    %10 = tpu.matmul %4, %9, %cst_8 {dimension_numbers = #tpu.dot_dimension_numbers<[1], [0], [0], [1], [0, 0, 1, 1], [], []>} : vector<8x32xbf16>, vector<32x128xbf16>, vector<8x128xf32> -> vector<8x128xf32>
    %11 = arith.addf %8, %10 : vector<8x128xf32>
    %c0_9 = arith.constant 0 : index
    %c0_10 = arith.constant 0 : index
    %12 = vector.load %arg5[%c0_9, %c0_10] : memref<1x128xf32, #tpu.memory_space<vmem>>, vector<1x128xf32>
    %13 = vector.broadcast %12 : vector<1x128xf32> to vector<8x128xf32>
    %14 = arith.addf %11, %13 : vector<8x128xf32>
    %cst_11 = arith.constant dense<0xFF800000> : vector<8xf32>
    %15 = vector.multi_reduction <maximumf>, %14, %cst_11 [1] : vector<8x128xf32> to vector<8xf32>
    %16 = vector.shape_cast %15 : vector<8xf32> to vector<8x1xf32>
    %17 = vector.broadcast %16 : vector<8x1xf32> to vector<8x128xf32>
    %18 = arith.subf %14, %17 : vector<8x128xf32>
    %19 = math.exp %18 : vector<8x128xf32>
    %cst_12 = arith.constant dense<0.000000e+00> : vector<8xf32>
    %20 = vector.multi_reduction <add>, %19, %cst_12 [1] : vector<8x128xf32> to vector<8xf32>
    %21 = vector.shape_cast %20 : vector<8xf32> to vector<8x1xf32>
    %22 = tpu.reciprocal %21 {approx = true} : vector<8x1xf32> -> vector<8x1xf32>
    %23 = vector.broadcast %22 : vector<8x1xf32> to vector<8x128xf32>
    %24 = arith.mulf %19, %23 : vector<8x128xf32>
    %c0_13 = arith.constant 0 : index
    %c0_14 = arith.constant 0 : index
    %c0_15 = arith.constant 0 : index
    %25 = vector.load %arg14[%c0_13, %c0_14, %c0_15] : memref<1x8x128xf32, #tpu.memory_space<vmem>>, vector<1x8x128xf32>
    %26 = vector.shape_cast %25 : vector<1x8x128xf32> to vector<8x128xf32>
    %27 = vector.shape_cast %24 : vector<8x128xf32> to vector<1x8x128xf32>
    tpu.vector_store %arg14[%c0_13, %c0_14, %c0_15], %27 {strides = array<i32>} : memref<1x8x128xf32, #tpu.memory_space<vmem>>, vector<1x8x128xf32>,
    %28 = arith.truncf %24 : vector<8x128xf32> to vector<8x128xbf16>
    %29 = vector.shape_cast %28 : vector<8x128xbf16> to vector<8x1x128xbf16>
    %c0_16 = arith.constant 0 : index
    %c0_17 = arith.constant 0 : index
    %c0_18 = arith.constant 0 : index
    %30 = vector.load %arg3[%c0_16, %c0_17, %c0_18] : memref<8x32x128xbf16, #tpu.memory_space<vmem>>, vector<8x32x128xbf16>
    %31 = vector.broadcast %29 : vector<8x1x128xbf16> to vector<8x32x128xbf16>
    %32 = arith.mulf %31, %30 : vector<8x32x128xbf16>
    %33 = arith.extf %32 : vector<8x32x128xbf16> to vector<8x32x128xf32>
    %cst_19 = arith.constant dense<0.000000e+00> : vector<8x32xf32>
    %34 = vector.multi_reduction <add>, %33, %cst_19 [2] : vector<8x32x128xf32> to vector<8x32xf32>
    %c0_20 = arith.constant 0 : index
    %c0_21 = arith.constant 0 : index
    %35 = vector.load %arg6[%c0_20, %c0_21] : memref<64x32xbf16, #tpu.memory_space<vmem>>, vector<32x32xbf16>
    %cst_22 = arith.constant dense<0.000000e+00> : vector<8x32xf32>
    %36 = tpu.matmul %6, %35, %cst_22 {dimension_numbers = #tpu.dot_dimension_numbers<[1], [0], [0], [1], [0, 0, 1, 1], [], []>} : vector<8x32xbf16>, vector<32x32xbf16>, vector<8x32xf32> -> vector<8x32xf32>
    %37 = arith.truncf %34 : vector<8x32xf32> to vector<8x32xbf16>
    %c32_23 = arith.constant 32 : index
    %c0_24 = arith.constant 0 : index
    %38 = vector.load %arg6[%c32_23, %c0_24] : memref<64x32xbf16, #tpu.memory_space<vmem>>, vector<32x32xbf16>
    %cst_25 = arith.constant dense<0.000000e+00> : vector<8x32xf32>
    %39 = tpu.matmul %37, %38, %cst_25 {dimension_numbers = #tpu.dot_dimension_numbers<[1], [0], [0], [1], [0, 0, 1, 1], [], []>} : vector<8x32xbf16>, vector<32x32xbf16>, vector<8x32xf32> -> vector<8x32xf32>
    %40 = arith.addf %36, %39 : vector<8x32xf32>
    %c0_26 = arith.constant 0 : index
    %c0_27 = arith.constant 0 : index
    %41 = vector.load %arg7[%c0_26, %c0_27] : memref<1x32xf32, #tpu.memory_space<vmem>>, vector<1x32xf32>
    %42 = vector.broadcast %41 : vector<1x32xf32> to vector<8x32xf32>
    %43 = arith.addf %40, %42 : vector<8x32xf32>
    %cst_28 = arith.constant 0.000000e+00 : f32
    %44 = vector.broadcast %cst_28 : f32 to vector<8x32xf32>
    %45 = arith.maximumf %43, %44 : vector<8x32xf32>
    %46 = arith.truncf %45 : vector<8x32xf32> to vector<8x32xbf16>
    %c0_29 = arith.constant 0 : index
    %c0_30 = arith.constant 0 : index
    %47 = vector.load %arg8[%c0_29, %c0_30] : memref<64x128xbf16, #tpu.memory_space<vmem>>, vector<32x128xbf16>
    %cst_31 = arith.constant dense<0.000000e+00> : vector<8x128xf32>
    %48 = tpu.matmul %46, %47, %cst_31 {dimension_numbers = #tpu.dot_dimension_numbers<[1], [0], [0], [1], [0, 0, 1, 1], [], []>} : vector<8x32xbf16>, vector<32x128xbf16>, vector<8x128xf32> -> vector<8x128xf32>
    %c32_32 = arith.constant 32 : index
    %c0_33 = arith.constant 0 : index
    %49 = vector.load %arg8[%c32_32, %c0_33] : memref<64x128xbf16, #tpu.memory_space<vmem>>, vector<32x128xbf16>
    %cst_34 = arith.constant dense<0.000000e+00> : vector<8x128xf32>
    %50 = tpu.matmul %4, %49, %cst_34 {dimension_numbers = #tpu.dot_dimension_numbers<[1], [0], [0], [1], [0, 0, 1, 1], [], []>} : vector<8x32xbf16>, vector<32x128xbf16>, vector<8x128xf32> -> vector<8x128xf32>
    %51 = arith.addf %48, %50 : vector<8x128xf32>
    %c0_35 = arith.constant 0 : index
    %c0_36 = arith.constant 0 : index
    %52 = vector.load %arg9[%c0_35, %c0_36] : memref<1x128xf32, #tpu.memory_space<vmem>>, vector<1x128xf32>
    %53 = vector.broadcast %52 : vector<1x128xf32> to vector<8x128xf32>
    %54 = arith.addf %51, %53 : vector<8x128xf32>
    %55 = vector.extract_strided_slice %54 {offsets = [0, 0], sizes = [8, 64], strides = [1, 1]} : vector<8x128xf32> to vector<8x64xf32>
    %56 = arith.negf %55 : vector<8x64xf32>
    %57 = math.exp %56 : vector<8x64xf32>
    %cst_37 = arith.constant 1.000000e+00 : f32
    %58 = vector.broadcast %cst_37 : f32 to vector<8x64xf32>
    %59 = arith.addf %58, %57 : vector<8x64xf32>
    %60 = arith.divf %58, %59 : vector<8x64xf32>
    %61 = vector.extract_strided_slice %60 {offsets = [0, 0], sizes = [8, 32], strides = [1, 1]} : vector<8x64xf32> to vector<8x32xf32>
    %62 = vector.extract_strided_slice %60 {offsets = [0, 32], sizes = [8, 32], strides = [1, 1]} : vector<8x64xf32> to vector<8x32xf32>
    %63 = vector.extract_strided_slice %54 {offsets = [0, 64], sizes = [8, 32], strides = [1, 1]} : vector<8x128xf32> to vector<8x32xf32>
    %64 = vector.extract_strided_slice %54 {offsets = [0, 96], sizes = [8, 32], strides = [1, 1]} : vector<8x128xf32> to vector<8x32xf32>
    %65 = arith.mulf %61, %64 : vector<8x32xf32>
    %66 = arith.addf %63, %65 : vector<8x32xf32>
    %67 = math.tanh %66 : vector<8x32xf32>
    %cst_38 = arith.constant 1.000000e+00 : f32
    %68 = vector.broadcast %cst_38 : f32 to vector<8x32xf32>
    %69 = arith.subf %68, %62 : vector<8x32xf32>
    %70 = arith.mulf %69, %67 : vector<8x32xf32>
    %71 = arith.mulf %62, %3 : vector<8x32xf32>
    %72 = arith.addf %70, %71 : vector<8x32xf32>
    %c0_39 = arith.constant 0 : index
    %c0_40 = arith.constant 0 : index
    %73 = vector.load %arg15[%c0_39, %c0_40] : memref<8x32xf32, #tpu.memory_space<vmem>>, vector<8x32xf32>
    tpu.vector_store %arg15[%c0_39, %c0_40], %72 {strides = array<i32>} : memref<8x32xf32, #tpu.memory_space<vmem>>, vector<8x32xf32>,
    %c5_i32 = arith.constant 5 : i32
    %74 = arith.cmpi eq, %arg0, %c5_i32 : i32
    %75 = arith.extui %74 : i1 to i32
    %c0_i32_41 = arith.constant 0 : i32
    %76 = arith.cmpi ne, %75, %c0_i32_41 : i32
    scf.if %76 {
      %c0_52 = arith.constant 0 : index
      %c0_53 = arith.constant 0 : index
      %97 = vector.load %arg13[%c0_52, %c0_53] : memref<8x32xf32, #tpu.memory_space<vmem>>, vector<8x32xf32>
      tpu.vector_store %arg13[%c0_52, %c0_53], %72 {strides = array<i32>} : memref<8x32xf32, #tpu.memory_space<vmem>>, vector<8x32xf32>,
    } else {
    }
    %77 = arith.truncf %72 : vector<8x32xf32> to vector<8x32xbf16>
    %c0_42 = arith.constant 0 : index
    %c0_43 = arith.constant 0 : index
    %78 = vector.load %arg10[%c0_42, %c0_43] : memref<32x128xbf16, #tpu.memory_space<vmem>>, vector<32x128xbf16>
    %cst_44 = arith.constant dense<0.000000e+00> : vector<8x128xf32>
    %79 = tpu.matmul %77, %78, %cst_44 {dimension_numbers = #tpu.dot_dimension_numbers<[1], [0], [0], [1], [0, 0, 1, 1], [], []>} : vector<8x32xbf16>, vector<32x128xbf16>, vector<8x128xf32> -> vector<8x128xf32>
    %c0_45 = arith.constant 0 : index
    %c0_46 = arith.constant 0 : index
    %80 = vector.load %arg11[%c0_45, %c0_46] : memref<1x128xf32, #tpu.memory_space<vmem>>, vector<1x128xf32>
    %81 = vector.broadcast %80 : vector<1x128xf32> to vector<8x128xf32>
    %82 = arith.addf %79, %81 : vector<8x128xf32>
    %cst_47 = arith.constant dense<0xFF800000> : vector<8xf32>
    %83 = vector.multi_reduction <maximumf>, %82, %cst_47 [1] : vector<8x128xf32> to vector<8xf32>
    %84 = vector.shape_cast %83 : vector<8xf32> to vector<8x1xf32>
    %85 = vector.broadcast %84 : vector<8x1xf32> to vector<8x128xf32>
    %86 = arith.subf %82, %85 : vector<8x128xf32>
    %87 = math.exp %86 : vector<8x128xf32>
    %cst_48 = arith.constant dense<0.000000e+00> : vector<8xf32>
    %88 = vector.multi_reduction <add>, %87, %cst_48 [1] : vector<8x128xf32> to vector<8xf32>
    %89 = vector.shape_cast %88 : vector<8xf32> to vector<8x1xf32>
    %90 = math.log %89 : vector<8x1xf32>
    %91 = arith.addf %90, %84 : vector<8x1xf32>
    %92 = vector.broadcast %91 : vector<8x1xf32> to vector<8x128xf32>
    %93 = arith.subf %82, %92 : vector<8x128xf32>
    %c0_49 = arith.constant 0 : index
    %c0_50 = arith.constant 0 : index
    %c0_51 = arith.constant 0 : index
    %94 = vector.load %arg12[%c0_49, %c0_50, %c0_51] : memref<1x8x128xf32, #tpu.memory_space<vmem>>, vector<1x8x128xf32>
    %95 = vector.shape_cast %94 : vector<1x8x128xf32> to vector<8x128xf32>
    %96 = vector.shape_cast %93 : vector<8x128xf32> to vector<1x8x128xf32>
    tpu.vector_store %arg12[%c0_49, %c0_50, %c0_51], %96 {strides = array<i32>} : memref<1x8x128xf32, #tpu.memory_space<vmem>>, vector<1x8x128xf32>,
    return
  }
  func.func @transform_0(%arg0: i32) -> (i32, i32, i32) {
    %c0_i32 = arith.constant 0 : i32
    %c0_i32_0 = arith.constant 0 : i32
    %c0_i32_1 = arith.constant 0 : i32
    return %arg0, %c0_i32, %c0_i32_0 : i32, i32, i32
  }
  func.func @transform_1(%arg0: i32) -> (i32, i32) {
    %c0_i32 = arith.constant 0 : i32
    %c0_i32_0 = arith.constant 0 : i32
    %c0_i32_1 = arith.constant 0 : i32
    return %c0_i32, %c0_i32_0 : i32, i32
  }
  func.func @transform_2(%arg0: i32) -> (i32, i32, i32) {
    %c0_i32 = arith.constant 0 : i32
    %c0_i32_0 = arith.constant 0 : i32
    %c0_i32_1 = arith.constant 0 : i32
    %c0_i32_2 = arith.constant 0 : i32
    return %c0_i32, %c0_i32_0, %c0_i32_1 : i32, i32, i32
  }
  func.func @transform_3(%arg0: i32) -> (i32, i32) {
    %c0_i32 = arith.constant 0 : i32
    %c0_i32_0 = arith.constant 0 : i32
    %c0_i32_1 = arith.constant 0 : i32
    return %c0_i32, %c0_i32_0 : i32, i32
  }
  func.func @transform_4(%arg0: i32) -> (i32, i32) {
    %c0_i32 = arith.constant 0 : i32
    %c0_i32_0 = arith.constant 0 : i32
    %c0_i32_1 = arith.constant 0 : i32
    return %c0_i32, %c0_i32_0 : i32, i32
  }
  func.func @transform_5(%arg0: i32) -> (i32, i32) {
    %c0_i32 = arith.constant 0 : i32
    %c0_i32_0 = arith.constant 0 : i32
    %c0_i32_1 = arith.constant 0 : i32
    return %c0_i32, %c0_i32_0 : i32, i32
  }
  func.func @transform_6(%arg0: i32) -> (i32, i32) {
    %c0_i32 = arith.constant 0 : i32
    %c0_i32_0 = arith.constant 0 : i32
    %c0_i32_1 = arith.constant 0 : i32
    return %c0_i32, %c0_i32_0 : i32, i32
  }
  func.func @transform_7(%arg0: i32) -> (i32, i32) {
    %c0_i32 = arith.constant 0 : i32
    %c0_i32_0 = arith.constant 0 : i32
    %c0_i32_1 = arith.constant 0 : i32
    return %c0_i32, %c0_i32_0 : i32, i32
  }
  func.func @transform_8(%arg0: i32) -> (i32, i32) {
    %c0_i32 = arith.constant 0 : i32
    %c0_i32_0 = arith.constant 0 : i32
    %c0_i32_1 = arith.constant 0 : i32
    return %c0_i32, %c0_i32_0 : i32, i32
  }
  func.func @transform_9(%arg0: i32) -> (i32, i32) {
    %c0_i32 = arith.constant 0 : i32
    %c0_i32_0 = arith.constant 0 : i32
    %c0_i32_1 = arith.constant 0 : i32
    return %c0_i32, %c0_i32_0 : i32, i32
  }
  func.func @transform_10(%arg0: i32) -> (i32, i32) {
    %c0_i32 = arith.constant 0 : i32
    %c0_i32_0 = arith.constant 0 : i32
    %c0_i32_1 = arith.constant 0 : i32
    return %c0_i32, %c0_i32_0 : i32, i32
  }
  func.func @transform_11(%arg0: i32) -> (i32, i32, i32) {
    %c0_i32 = arith.constant 0 : i32
    %c0_i32_0 = arith.constant 0 : i32
    %c0_i32_1 = arith.constant 0 : i32
    return %arg0, %c0_i32, %c0_i32_0 : i32, i32, i32
  }
  func.func @transform_12(%arg0: i32) -> (i32, i32) {
    %c0_i32 = arith.constant 0 : i32
    %c0_i32_0 = arith.constant 0 : i32
    %c0_i32_1 = arith.constant 0 : i32
    return %c0_i32, %c0_i32_0 : i32, i32
  }
  func.func @transform_13(%arg0: i32) -> (i32, i32, i32) {
    %c0_i32 = arith.constant 0 : i32
    %c0_i32_0 = arith.constant 0 : i32
    %c0_i32_1 = arith.constant 0 : i32
    return %arg0, %c0_i32, %c0_i32_0 : i32, i32, i32
  }
}

</mosaic_0001>

<bundles_post_ra>
// kernel: attn_decoder_decode.1
= control target key start
LH: loop header
LB: loop body
LE: loop exit
PB: predicated region body
PF: predicated region fallthrough
CT: control target
= control target key end

     0   :  { %s2157_s0 = inlined_call_operand.vmem [shape: bf16[6,8,32], index: 0, kind: input, shape index: {}]   ;;  %s2158_s1 = inlined_call_operand.vmem [shape: f32[8,32], index: 1, kind: input, shape index: {}]   ;;  %s2159_s2 = inlined_call_operand.vmem [shape: bf16[8,32,128], index: 2, kind: input, shape index: {}]   ;;  %s2160_s3 = inlined_call_operand.vmem [shape: bf16[64,128], index: 3, kind: input, shape index: {}]   ;;  %s2161_s4 = inlined_call_operand.vmem [shape: f32[1,128], index: 4, kind: input, shape index: {}]   ;;  %s2162_s5 = inlined_call_operand.vmem [shape: bf16[64,32], index: 5, kind: input, shape index: {}]   ;;  %s2163_s6 = inlined_call_operand.vmem [shape: f32[1,32], index: 6, kind: input, shape index: {}]   ;;  %s2164_s7 = inlined_call_operand.vmem [shape: bf16[64,128], index: 7, kind: input, shape index: {}]   ;;  %s2165_s8 = inlined_call_operand.vmem [shape: f32[1,128], index: 8, kind: input, shape index: {}]   ;;  %s2166_s9 = inlined_call_operand.vmem [shape: bf16[32,128], index: 9, kind: input, shape index: {}]   ;;  %s2167_s10 = inlined_call_operand.vmem [shape: f32[1,128], index: 10, kind: input, shape index: {}]   ;;  %s2168_s11 = inlined_call_operand.hbm [shape: f32[6,8,128], index: 11, kind: output, shape index: {0}]   ;;  %s2169_s12 = inlined_call_operand.hbm [shape: f32[8,32], index: 12, kind: output, shape index: {1}]   ;;  %s2170_s13 = inlined_call_operand.hbm [shape: f32[6,8,128], index: 13, kind: output, shape index: {2}]  }
   0x1   :  { %2177 = sst [smem:[#allocation14_spill]] %s2157_s0 }
   0x2   :  { %2178 = sst [smem:[#allocation15_spill]] %s2158_s1 }
   0x3   :  { %19 = vsyncpa [#allocation4], 0 }
   0x4   :  { %21 = vsyncpa [#allocation4 + $0x1], 0 }
   0x5   :  { %22 = vsyncpa [#allocation6], 0  ;;  %s1799_s25 = smov 0   ;;  %s1801_s26 = smov 0  }
   0x6   :  { %s1803_s27 = smov 0   ;;  %s1805_s28 = smov 0  }
   0x7 LB: > { %2179 = sst [smem:[#allocation10_spill]] %s1715_s26  ;;  %s1818_s29 = sadd.s32 4294967295, %s1723_s28   ;;  %s1723_s28 = sphi %s1805_s28, %s2191_s28   ;;  %s1719_s27 = sphi %s1803_s27, %s2194_s27   ;;  %s1715_s26 = sphi %s1801_s26, %s2193_s26   ;;  %s1711_s25 = sphi %s1799_s25, %s2192_s25  }
   0x8   : > { %2180 = sst [smem:[#allocation11_spill]] %s1719_s27  ;;  %s2171_s30 = sadd.s32 4294967294, %s1723_s28  }
   0x9   : > { %s1822_s14 = sadd.s32 1, %s1723_s28   ;;  %s271_s15 = sadd.s32 1, %s1719_s27 }
   0xa   : > { %2181 = sst [smem:[#allocation12_spill]] %s1822_s14  ;;  %s268_s16 = ssub.s32 %s1723_s28, %s1822_s14 }
   0xb   : > { %p281_p0 = scmp.ne.s32.totalorder %s1719_s27, %s1715_s26  ;;  %p269_p1 = scmp.eq.s32.totalorder %s268_s16, 0 }
   0xc   : > { %p282_p2 = scmp.eq.s32.totalorder %s1818_s29, 5  ;;  %p287_p3 = scmp.ne.s32.totalorder %s1715_s26, %s1711_s25 }
   0xd   : > { %p288_p4 = scmp.eq.s32.totalorder %s2171_s30, 5  ;;  %p1354_p7 = scmp.ge.s32.totalorder %s1723_s28, 1 }
   0xe   : > { %s1834_s17 = scalar_select %p269_p1, %s1719_s27, %s271_s15  }
   0xf   : > { %p1838_p5 = por %p282_p2, %p281_p0  ;;  %p1842_p6 = por %p288_p4, %p287_p3 }
  0x10   : > { %2182 = sst [smem:[#allocation13_spill]] %s1834_s17  ;;  %p390_p8 = scmp.lt.s32.totalorder %s1723_s28, 7 }
  0x12   : > { %p391_p9 = pnand %p1354_p7, %p390_p8 }
  0x13   : > { %s426_s20 = sand.u32 (!%p391_p9), 1, %s1715_s26   ;;  %p438_p10 = scmp.lt.s32.totalorder (!%p391_p9), %s1818_s29, 5 }
  0x14   : > { %394 = sbr.rel (%p391_p9) target bundleno = 1903 (0x76f), region = 64  ;;  %s1850_s21 = sshll.u32 (!%p391_p9), %s426_s20, 3 }
  0x15   : > { %s2185_s0 = sld [smem:[#allocation14_spill]] (!%p391_p9)  ;;  %s2176_s30 = scalar_lea.vmem (!%p391_p9), [#allocation7], %s1850_s21 }
  0x16   : > { %p1358_p11 = scmp.ne.s32.totalorder (!%p391_p9), %s1818_s29, 0 }
  0x19   : > { %s439_s22 = scalar_select %p438_p10, %s1818_s29, 5 }
  0x1a   : > { %446 = sbr.rel (%p1358_p11) target bundleno = 34 (0x22), region = 68  ;;  %s2186_s1 = sld [smem:[#allocation15_spill]] (!%p1358_p11) }
  0x1b   : > { %s1357_s23 = sshll.u32 %s439_s22, 2 }
  0x1c   : > { %s441_s15 = scalar_lea.vmem %s2185_s0, %s1357_s23 }
  0x1f   : > { %vm448_vm0 = vcmask 261120  }
  0x20   : > { %v447_v0 = vld [vmem:[%s2186_s1] sm:$0xff] }
  0x21   : > { %449 = vst.msk [vmem:[#allocation2] sm:$0xff] %vm448_vm0, %v447_v0 }
  0x22 PF: > { %v1439_v1 = vld [vmem:[%s2160_s3 + $0x18] sm:$0xff]  ;;  %v1437_v2 = vld [vmem:[%s2160_s3 + $0x8] sm:$0xff]  ;;  %v1438_v3 = vld [vmem:[%s2160_s3 + $0x10] sm:$0xff]  ;;  %vm473_vm1 = vcmask 261120   ;;  %vm536_vm2 = vcmask 1040384   ;;  %vm541_vm3 = vcmask 1041409  }
  0x23   : > { %v1436_v4 = vld [vmem:[%s2160_s3] sm:$0xff]  ;;  %483 = vmatpush.bf16.msra.mxu0 %v1439_v1  ;;  %511 = vmatpush.bf16.msra.mxu1 %v1437_v2  ;;  %vm545_vm4 = vcmask 1042434   ;;  %v1514_v29 = vld [vmem:[%s2159_s2 + $0x8] sm:$0xff]   ;;  %v1515_v39 = vld [vmem:[%s2159_s2 + $0x10] sm:$0xff]   ;;  %vm549_vm5 = vcmask 1043459   ;;  %vm902_vm6 = vcmask 130112  }
  0x24   : > { %v1880_v7 = vld [vmem:[%s441_s15] sm:$0xf]  ;;  %v1456_v37 = vunpack.c.l.bf16 %v1514_v29  ;;  %v1457_v38 = vunpack.c.h.bf16 %v1514_v29  ;;  %v1516_v46 = vld [vmem:[%s2159_s2 + $0x18] sm:$0xff]   ;;  %v1460_v48 = vunpack.c.l.bf16 %v1515_v39  ;;  %v1461_v49 = vunpack.c.h.bf16 %v1515_v39  ;;  %s1725_s25 = smov 32   ;;  %s1726_s26 = smov 64  }
  0x25   : > { %v1583_v8 = vld [vmem:[%s2161_s4] ss:$0 sm:$0xff]  ;;  %v1464_v51 = vunpack.c.l.bf16 %v1516_v46  ;;  %v1465_v52 = vunpack.c.h.bf16 %v1516_v46  ;;  %vm906_vm7 = vcmask 195712   ;;  %vm910_vm8 = vcmask 261312   ;;  %s1727_s27 = smov 96   ;;  %p1418_p12 = scmp.ne.s32.totalorder %s1818_s29, 5 }
  0x26   : > { %v1451_v34 = vld [vmem:[%s2159_s2] sm:$0xff]   ;;  %vm964_vm9 = vcmask 1044484   ;;  %vm966_vm10 = vcmask 1045509   ;;  %vm968_vm11 = vcmask 1046534   ;;  %vm970_vm12 = vcmask 1047559  }
  0x27   : > { %484 = vmatpush.bf16.msra.mxu0 %v1438_v3  ;;  %512 = vmatpush.bf16.msra.mxu1 %v1436_v4  ;;  %v1452_v43 = vunpack.c.l.bf16 %v1451_v34  ;;  %v1453_v44 = vunpack.c.h.bf16 %v1451_v34 }
  0x28   : > { %v1874_v5 = vld [vmem:[#allocation2] sm:$0xff] }
  0x29   : > { %v1878_v6 = vpack.c.bf16 %v1874_v5, %v1874_v5 }
  0x2a   : > { %1376 = vmatmul.msk.bf16.vlgmr.msra.gmra.mxu1 %vm473_vm1, %v1880_v7 }
  0x2b   : > { %1367 = vmatmul.msk.bf16.vlgmr.msra.gmra.mxu0 %vm473_vm1, %v1878_v6 }
  0xa7   : > { %v514_v10 = vpop.f32.mrf.mxu1 }
  0xa8   : > { %v486_v9 = vpop.f32.mrf.mxu0 }
  0xa9   : > { %v515_v11 = vadd.f32 %v514_v10, %v486_v9  ;;  %v1518_v9 = vld [vmem:[%s2159_s2 + $0x28] sm:$0xff]  }
  0xab   : > { %v522_v12 = vadd.f32 %v1583_v8, %v515_v11 }
  0xad   : > { %523 = vmax.xlane.f32.xlu0 %v522_v12 }
  0xaf   : > { %v516_v14 = vpop.f32.mrf.mxu1 }
  0xb0   : > { %v488_v13 = vpop.f32.mrf.mxu0 }
 0x120   : > { %v524_v15 = vpop.xlane.xlu0 %523 }
 0x121   : > { %v525_v16 = vsub.f32 %v522_v12, %v524_v15  ;;  %v1472_v12 = vunpack.c.l.bf16 %v1518_v9  ;;  %v1473_v15 = vunpack.c.h.bf16 %v1518_v9 }
 0x123   : > { %v526_v17 = vmul.f32 1.442695, %v525_v16 }
 0x125   : > { %1586 = vpow2.f32 %v526_v17 }
 0x12b   : > { %v1587_v18 = vpop.eup %1586 }
 0x12c   : > { %528 = vadd.xlane.f32.xlu0 %v1587_v18 }
 0x19f   : > { %v529_v19 = vpop.xlane.xlu0 %528 }
 0x1a0   : > { %1588 = vrcp.f32 %v529_v19 }
 0x1a6   : > { %v1589_v20 = vpop.eup %1588 }
 0x1a7   : > { %v531_v21 = vmul.f32 %v1589_v20, %v1587_v18 }
 0x1a9   : > { %532 = vst [vmem:[%s2176_s30] sm:$0xff] %v531_v21  ;;  %v1891_v22 = vpack.c.bf16 %v531_v21, %v531_v21 }
 0x1ab   : > { %v535_v23 = vrot.slane %v1891_v22, 3 }
 0x1ad   : > { %v539_v24 = vsel %vm536_vm2, %v1891_v22, %v535_v23  ;;  %v542_v25 = vsel %vm541_vm3, %v1891_v22, %v535_v23  ;;  %v546_v33 = vsel %vm545_vm4, %v1891_v22, %v535_v23  ;;  %v550_v17 = vsel %vm549_vm5, %v1891_v22, %v535_v23 }
 0x1ae   : > { %v1377_v26 = vpack.i.b16 %v539_v24, %v539_v24  ;;  %v554_v27 = vunpack.i.h.s16 %v539_v24  ;;  %v1897_v28 = vrot.slane %v542_v25, 1  ;;  %v1912_v41 = vrot.slane %v546_v33, 2 }
 0x1af   : > { %v1924_v19 = vrot.slane %v550_v17, 3 }
 0x1b0   : > { %v601_v30 = vperm.slane %v1377_v26, 0  ;;  %v594_v31 = vpack.i.b16 %v554_v27, %v554_v27  ;;  %v1378_v32 = vpack.i.b16 %v1897_v28, %v1897_v28  ;;  %v1379_v54 = vpack.i.b16 %v1912_v41, %v1912_v41  ;;  %v1517_v26 = vld [vmem:[%s2159_s2 + $0x20] sm:$0xff]  }
 0x1b1   : > { %v1521_v27 = vld [vmem:[%s2159_s2 + $0x40] sm:$0xff]   ;;  %v1468_v22 = vunpack.c.l.bf16 %v1517_v26  ;;  %v1469_v23 = vunpack.c.h.bf16 %v1517_v26  ;;  %v1520_v26 = vld [vmem:[%s2159_s2 + $0x38] sm:$0xff]  }
 0x1b2   : > { %v610_v35 = vpack.i.b16 %v601_v30, %v601_v30  ;;  %v602_v36 = vperm.slane %v594_v31, 0  ;;  %v603_v40 = vperm.slane %v1378_v32, 0  ;;  %v605_v1 = vperm.slane %v1379_v54, 0 }
 0x1b3   : > { %v1380_v30 = vpack.i.b16 %v1924_v19, %v1924_v19  ;;  %v1484_v32 = vunpack.c.l.bf16 %v1521_v27  ;;  %v1485_v33 = vunpack.c.h.bf16 %v1521_v27 }
 0x1b4   : > { %v612_v42 = vperm.slane %v610_v35, 0  ;;  %v614_v45 = vpack.i.b16 %v602_v36, %v602_v36  ;;  %v618_v53 = vpack.i.b16 %v603_v40, %v603_v40  ;;  %v626_v13 = vpack.i.b16 %v605_v1, %v605_v1 }
 0x1b6   : > { %v641_v47 = vunpack.c.l.bf16 %v612_v42  ;;  %v616_v50 = vperm.slane %v614_v45, 0  ;;  %v620_v0 = vperm.slane %v618_v53, 0  ;;  %v628_v18 = vperm.slane %v626_v13, 0 }
 0x1b7   : > { %v558_v53 = vunpack.i.h.s16 %v1912_v41  ;;  %v1526_v41 = vld [vmem:[%s2159_s2 + $0x68] sm:$0xff]  }
 0x1b8   : > { %v683_v55 = vmul.f32 %v1456_v37, %v641_v47  ;;  %v684_v56 = vmul.f32 %v1457_v38, %v641_v47  ;;  %v681_v57 = vmul.f32 %v1452_v43, %v641_v47  ;;  %v682_v58 = vmul.f32 %v1453_v44, %v641_v47  ;;  %v1522_v44 = vld [vmem:[%s2159_s2 + $0x48] sm:$0xff]  }
 0x1b9   : > { %v642_v59 = vunpack.c.l.bf16 %v616_v50  ;;  %v643_v16 = vunpack.c.l.bf16 %v620_v0  ;;  %v645_v34 = vunpack.c.l.bf16 %v628_v18  ;;  %v607_v37 = vperm.slane %v1380_v30, 0 }
 0x1ba   : > { %v714_v60 = vpack.c.bf16 %v684_v56, %v683_v55  ;;  %v713_v61 = vpack.c.bf16 %v682_v58, %v681_v57  ;;  %v556_v38 = vunpack.i.h.s16 %v1897_v28  ;;  %v1488_v50 = vunpack.c.l.bf16 %v1522_v44  ;;  %v1525_v58 = vld [vmem:[%s2159_s2 + $0x60] sm:$0xff]  }
 0x1bb   : > { %v685_v62 = vmul.f32 %v1460_v48, %v642_v59  ;;  %v686_v63 = vmul.f32 %v1461_v49, %v642_v59  ;;  %v687_v4 = vmul.f32 %v1464_v51, %v642_v59  ;;  %v688_v8 = vmul.f32 %v1465_v52, %v642_v59 }
 0x1bc   : > { %v731_v2 = vunpack.c.l.bf16 %v714_v60  ;;  %v729_v3 = vunpack.c.l.bf16 %v713_v61  ;;  %v730_v20 = vunpack.c.h.bf16 %v713_v61  ;;  %v691_v24 = vmul.f32 %v1472_v12, %v643_v16  ;;  %v1519_v12 = vld [vmem:[%s2159_s2 + $0x30] sm:$0xff]  }
 0x1bd   : > { %v715_v10 = vpack.c.bf16 %v686_v63, %v685_v62  ;;  %v716_v14 = vpack.c.bf16 %v688_v8, %v687_v4  ;;  %v692_v25 = vmul.f32 %v1473_v15, %v643_v16  ;;  %v732_v35 = vunpack.c.h.bf16 %v714_v60 }
 0x1be   : > { %765 = vadd.xlane.f32.xlu0 %v731_v2  ;;  %761 = vadd.xlane.f32.xlu1 %v729_v3  ;;  %v689_v36 = vmul.f32 %v1468_v22, %v643_v16  ;;  %v690_v40 = vmul.f32 %v1469_v23, %v643_v16  ;;  %v697_v42 = vmul.f32 %v1484_v32, %v645_v34  ;;  %v1489_v51 = vunpack.c.h.bf16 %v1522_v44  ;;  %v1524_v32 = vld [vmem:[%s2159_s2 + $0x58] sm:$0xff]  }
 0x1bf   : > { %v733_v11 = vunpack.c.l.bf16 %v715_v10  ;;  %v736_v21 = vunpack.c.h.bf16 %v716_v14  ;;  %v734_v29 = vunpack.c.h.bf16 %v715_v10  ;;  %v718_v31 = vpack.c.bf16 %v692_v25, %v691_v24 }
 0x1c0   : > { %v698_v43 = vmul.f32 %v1485_v33, %v645_v34  ;;  %v735_v45 = vunpack.c.l.bf16 %v716_v14  ;;  %v634_v46 = vpack.i.b16 %v607_v37, %v607_v37  ;;  %v596_v47 = vpack.i.b16 %v556_v38, %v556_v38 }
 0x1c1   : > { %769 = vadd.xlane.f32.xlu2 %v733_v11  ;;  %v739_v39 = vunpack.c.l.bf16 %v718_v31  ;;  %v717_v48 = vpack.c.bf16 %v690_v40, %v689_v36  ;;  %v699_v56 = vmul.f32 %v1488_v50, %v645_v34  ;;  %v700_v57 = vmul.f32 %v1489_v51, %v645_v34  ;;  %v1527_v50 = vld [vmem:[%s2159_s2 + $0x70] sm:$0xff]  }
 0x1c2   : > { %v721_v49 = vpack.c.bf16 %v698_v43, %v697_v42  ;;  %v636_v52 = vperm.slane %v634_v46, 0  ;;  %v604_v28 = vperm.slane %v596_v47, 0  ;;  %v598_v61 = vpack.i.b16 %v558_v53, %v558_v53 }
 0x1c3   : > { %v737_v54 = vunpack.c.l.bf16 %v717_v48  ;;  %v738_v59 = vunpack.c.h.bf16 %v717_v48  ;;  %v722_v62 = vpack.c.bf16 %v700_v57, %v699_v56  ;;  %v1500_v63 = vunpack.c.l.bf16 %v1525_v58 }
 0x1c4   : > { %v745_v55 = vunpack.c.l.bf16 %v721_v49  ;;  %v622_v60 = vpack.i.b16 %v604_v28, %v604_v28  ;;  %v1501_v0 = vunpack.c.h.bf16 %v1525_v58  ;;  %v647_v1 = vunpack.c.l.bf16 %v636_v52 }
 0x1c5   : > { %v606_v3 = vperm.slane %v598_v61, 0  ;;  %v560_v4 = vunpack.i.h.s16 %v1924_v19  ;;  %v740_v8 = vunpack.c.h.bf16 %v718_v31  ;;  %v748_v9 = vunpack.c.h.bf16 %v722_v62 }
 0x1c6   : > { %763 = vadd.xlane.f32.xlu1 %v730_v20  ;;  %775 = vadd.xlane.f32.xlu0 %v736_v21  ;;  %v624_v2 = vperm.slane %v622_v60, 0  ;;  %v705_v10 = vmul.f32 %v1500_v63, %v647_v1  ;;  %v706_v11 = vmul.f32 %v1501_v0, %v647_v1  ;;  %v1504_v13 = vunpack.c.l.bf16 %v1526_v41 }
 0x1c7   : > { %v747_v14 = vunpack.c.l.bf16 %v722_v62  ;;  %v1505_v15 = vunpack.c.h.bf16 %v1526_v41  ;;  %v630_v16 = vpack.i.b16 %v606_v3, %v606_v3  ;;  %v600_v17 = vpack.i.b16 %v560_v4, %v560_v4 }
 0x1c8   : > { %v725_v18 = vpack.c.bf16 %v706_v11, %v705_v10  ;;  %v1476_v20 = vunpack.c.l.bf16 %v1519_v12  ;;  %v1477_v21 = vunpack.c.h.bf16 %v1519_v12  ;;  %v644_v24 = vunpack.c.l.bf16 %v624_v2 }
 0x1c9   : > { %771 = vadd.xlane.f32.xlu2 %v734_v29  ;;  %v707_v19 = vmul.f32 %v1504_v13, %v647_v1  ;;  %v708_v25 = vmul.f32 %v1505_v15, %v647_v1  ;;  %v632_v27 = vperm.slane %v630_v16, 0  ;;  %v608_v29 = vperm.slane %v600_v17, 0  ;;  %v1528_v1 = vld [vmem:[%s2159_s2 + $0x78] sm:$0xff]  }
 0x1ca   : > { %v746_v22 = vunpack.c.h.bf16 %v721_v49  ;;  %v754_v23 = vunpack.c.h.bf16 %v725_v18  ;;  %v693_v30 = vmul.f32 %v1476_v20, %v644_v24  ;;  %v694_v31 = vmul.f32 %v1477_v21, %v644_v24  ;;  %v1523_v49 = vld [vmem:[%s2159_s2 + $0x50] sm:$0xff]  }
 0x1cb   : > { %v1480_v33 = vunpack.c.l.bf16 %v1520_v26  ;;  %v753_v34 = vunpack.c.l.bf16 %v725_v18  ;;  %v1481_v36 = vunpack.c.h.bf16 %v1520_v26  ;;  %v1496_v37 = vunpack.c.l.bf16 %v1524_v32 }
 0x1cc   : > { %v719_v38 = vpack.c.bf16 %v694_v31, %v693_v30  ;;  %v646_v40 = vunpack.c.l.bf16 %v632_v27  ;;  %v638_v42 = vpack.i.b16 %v608_v29, %v608_v29  ;;  %v1492_v28 = vunpack.c.l.bf16 %v1523_v49 }
 0x1cd   : > { %v695_v44 = vmul.f32 %v1480_v33, %v644_v24  ;;  %v1493_v53 = vunpack.c.h.bf16 %v1523_v49  ;;  %v1509_v57 = vunpack.c.h.bf16 %v1527_v50  ;;  %v1512_v4 = vunpack.c.l.bf16 %v1528_v1 }
 0x1ce   : > { %767 = vadd.xlane.f32.xlu1 %v732_v35  ;;  %781 = vadd.xlane.f32.xlu0 %v739_v39  ;;  %v726_v35 = vpack.c.bf16 %v708_v25, %v707_v19  ;;  %v1497_v39 = vunpack.c.h.bf16 %v1524_v32  ;;  %v742_v46 = vunpack.c.h.bf16 %v719_v38  ;;  %v703_v47 = vmul.f32 %v1496_v37, %v646_v40 }
 0x1cf   : > { %v640_v51 = vperm.slane %v638_v42, 0  ;;  %v702_v60 = vmul.f32 %v1493_v53, %v646_v40  ;;  %v741_v41 = vunpack.c.l.bf16 %v719_v38  ;;  %v897_v25 = vlaneseq }
 0x1d0   : > { %v755_v43 = vunpack.c.l.bf16 %v726_v35  ;;  %v704_v48 = vmul.f32 %v1497_v39, %v646_v40  ;;  %v756_v52 = vunpack.c.h.bf16 %v726_v35 }
 0x1d1   : > { %773 = vadd.xlane.f32.xlu2 %v735_v45  ;;  %v696_v45 = vmul.f32 %v1481_v36, %v644_v24  ;;  %v648_v58 = vunpack.c.l.bf16 %v640_v51 }
 0x1d2   : > { %v724_v56 = vpack.c.bf16 %v704_v48, %v703_v47 }
 0x1d3   : > { %v710_v0 = vmul.f32 %v1509_v57, %v648_v58  ;;  %v711_v11 = vmul.f32 %v1512_v4, %v648_v58 }
 0x1d4   : > { %v751_v62 = vunpack.c.l.bf16 %v724_v56  ;;  %v752_v15 = vunpack.c.h.bf16 %v724_v56 }
 0x1d6   : > { %777 = vadd.xlane.f32.xlu1 %v737_v54  ;;  %793 = vadd.xlane.f32.xlu0 %v745_v55  ;;  %v1508_v54 = vunpack.c.l.bf16 %v1527_v50  ;;  %v720_v55 = vpack.c.bf16 %v696_v45, %v695_v44 }
 0x1d8   : > { %v743_v61 = vunpack.c.l.bf16 %v720_v55  ;;  %v709_v63 = vmul.f32 %v1508_v54, %v648_v58  ;;  %v744_v13 = vunpack.c.h.bf16 %v720_v55 }
 0x1d9   : > { %779 = vadd.xlane.f32.xlu2 %v738_v59  ;;  %v701_v59 = vmul.f32 %v1492_v28, %v646_v40 }
 0x1da   : > { %v727_v3 = vpack.c.bf16 %v710_v0, %v709_v63 }
 0x1db   : > { %v723_v2 = vpack.c.bf16 %v702_v60, %v701_v59 }
 0x1dc   : > { %v757_v10 = vunpack.c.l.bf16 %v727_v3  ;;  %v758_v18 = vunpack.c.h.bf16 %v727_v3 }
 0x1dd   : > { %v750_v17 = vunpack.c.h.bf16 %v723_v2 }
 0x1de   : > { %783 = vadd.xlane.f32.xlu1 %v740_v8  ;;  %799 = vadd.xlane.f32.xlu0 %v748_v9  ;;  %v1513_v8 = vunpack.c.h.bf16 %v1528_v1  ;;  %v749_v9 = vunpack.c.l.bf16 %v723_v2 }
 0x1e0   : > { %v712_v12 = vmul.f32 %v1513_v8, %v648_v58 }
 0x1e1   : > { %797 = vadd.xlane.f32.xlu2 %v747_v14 }
 0x1e2   : > { %v728_v14 = vpack.c.bf16 %v712_v12, %v711_v11  ;;  %v1441_v11 = vld [vmem:[%s2162_s5 + $0x8] sm:$0xff] }
 0x1e3   : > { %1019 = vmatpush.bf16.msra.mxu3 %v1441_v11 }
 0x1e4   : > { %v760_v16 = vunpack.c.h.bf16 %v728_v14  ;;  %v759_v20 = vunpack.c.l.bf16 %v728_v14  ;;  %v1440_v14 = vld [vmem:[%s2162_s5] sm:$0xff] }
 0x1e6   : > { %795 = vadd.xlane.f32.xlu1 %v746_v22  ;;  %811 = vadd.xlane.f32.xlu0 %v754_v23  ;;  %v1964_v22 = vand.u32 127, %v897_v25 }
 0x1e7   : > { %1020 = vmatpush.bf16.msra.mxu3 %v1440_v14 }
 0x1e8   : > { %v1967_v31 = vadd.s32 4294967288, %v1964_v22  ;;  %v1973_v39 = vadd.s32 4294967272, %v1964_v22 }
 0x1e9   : > { %809 = vadd.xlane.f32.xlu2 %v753_v34  ;;  %v1970_v34 = vadd.s32 4294967280, %v1964_v22 }
 0x1ea   : > { %1398 = vmatmul.msk.bf16.vlgmr.msra.gmra.mxu3 %vm473_vm1, %v1880_v7 }
 0x1ee   : > { %813 = vadd.xlane.f32.xlu1 %v755_v43  ;;  %787 = vadd.xlane.f32.xlu0 %v742_v46 }
 0x1f1   : > { %815 = vadd.xlane.f32.xlu2 %v756_v52 }
 0x1f6   : > { %789 = vadd.xlane.f32.xlu1 %v743_v61  ;;  %805 = vadd.xlane.f32.xlu0 %v751_v62 }
 0x1f9   : > { %785 = vadd.xlane.f32.xlu2 %v741_v41 }
 0x1fe   : > { %801 = vadd.xlane.f32.xlu1 %v749_v9  ;;  %817 = vadd.xlane.f32.xlu0 %v757_v10 }
 0x201   : > { %791 = vadd.xlane.f32.xlu2 %v744_v13 }
 0x206   : > { %807 = vadd.xlane.f32.xlu1 %v752_v15  ;;  %823 = vadd.xlane.f32.xlu0 %v760_v16  ;;  %v1443_v15 = vld [vmem:[%s2162_s5 + $0x18] sm:$0xff]  ;;  %v1442_v16 = vld [vmem:[%s2162_s5 + $0x10] sm:$0xff] }
 0x207   : > { %994 = vmatpush.bf16.msra.mxu2 %v1443_v15 }
 0x209   : > { %803 = vadd.xlane.f32.xlu2 %v750_v17 }
 0x20b   : > { %995 = vmatpush.bf16.msra.mxu2 %v1442_v16 }
 0x20e   : > { %819 = vadd.xlane.f32.xlu1 %v758_v18 }
 0x211   : > { %821 = vadd.xlane.f32.xlu2 %v759_v20 }
 0x231   : > { %v766_v21 = vpop.xlane.xlu0 %765  ;;  %v762_v24 = vpop.xlane.xlu1 %761 }
 0x234   : > { %v770_v19 = vpop.xlane.xlu2 %769 }
 0x239   : > { %v764_v26 = vpop.xlane.xlu1 %763  ;;  %v776_v27 = vpop.xlane.xlu0 %775 }
 0x23a   : > { %v829_v29 = vpack.c.bf16 %v764_v26, %v762_v24 }
 0x23c   : > { %v772_v23 = vpop.xlane.xlu2 %771  ;;  %v865_v32 = vunpack.c.l.b16 %v829_v29  ;;  %v866_v33 = vunpack.c.h.b16 %v829_v29 }
 0x23d   : > { %v831_v30 = vpack.c.bf16 %v772_v23, %v770_v19 }
 0x23e   : > { %v899_v42 = vperm.slane %v865_v32, %v1964_v22  ;;  %v901_v43 = vperm.slane %v866_v33, %v1967_v31 }
 0x23f   : > { %v869_v37 = vunpack.c.l.b16 %v831_v30  ;;  %v870_v38 = vunpack.c.h.b16 %v831_v30 }
 0x240   : > { %v903_v52 = vsel %vm902_vm6, %v901_v43, %v899_v42 }
 0x241   : > { %v768_v35 = vpop.xlane.xlu1 %767  ;;  %v782_v36 = vpop.xlane.xlu0 %781  ;;  %v912_v48 = vperm.slane %v869_v37, %v1964_v22  ;;  %v913_v49 = vperm.slane %v870_v38, %v1967_v31 }
 0x242   : > { %v830_v40 = vpack.c.bf16 %v768_v35, %v766_v21 }
 0x243   : > { %v914_v60 = vsel %vm902_vm6, %v913_v49, %v912_v48 }
 0x244   : > { %v867_v44 = vunpack.c.l.b16 %v830_v40  ;;  %v868_v45 = vunpack.c.h.b16 %v830_v40  ;;  %v774_v46 = vpop.xlane.xlu2 %773 }
 0x245   : > { %v832_v47 = vpack.c.bf16 %v776_v27, %v774_v46 }
 0x246   : > { %v905_v50 = vperm.slane %v867_v44, %v1970_v34  ;;  %v909_v51 = vperm.slane %v868_v45, %v1973_v39 }
 0x247   : > { %v871_v28 = vunpack.c.l.b16 %v832_v47  ;;  %v872_v53 = vunpack.c.h.b16 %v832_v47 }
 0x248   : > { %v907_v54 = vsel %vm906_vm7, %v905_v50, %v903_v52 }
 0x249   : > { %v911_v55 = vsel %vm910_vm8, %v909_v51, %v907_v54  ;;  %v915_v56 = vperm.slane %v871_v28, %v1970_v34  ;;  %v917_v57 = vperm.slane %v872_v53, %v1973_v39  ;;  %v778_v58 = vpop.xlane.xlu1 %777  ;;  %v794_v59 = vpop.xlane.xlu0 %793 }
 0x24b   : > { %v916_v61 = vsel %vm906_vm7, %v915_v56, %v914_v60 }
 0x24c   : > { %v918_v62 = vsel %vm910_vm8, %v917_v57, %v916_v61  ;;  %v780_v63 = vpop.xlane.xlu2 %779 }
 0x24d   : > { %v1990_v0 = vsel %vm541_vm3, %v918_v62, %v911_v55  ;;  %v833_v17 = vpack.c.bf16 %v780_v63, %v778_v58 }
 0x24f   : > { %v873_v21 = vunpack.c.l.b16 %v833_v17  ;;  %v874_v24 = vunpack.c.h.b16 %v833_v17 }
 0x251   : > { %v784_v1 = vpop.xlane.xlu1 %783  ;;  %v800_v41 = vpop.xlane.xlu0 %799  ;;  %v919_v23 = vperm.slane %v873_v21, %v1964_v22  ;;  %v920_v30 = vperm.slane %v874_v24, %v1967_v31 }
 0x252   : > { %v834_v20 = vpack.c.bf16 %v784_v1, %v782_v36 }
 0x253   : > { %v921_v44 = vsel %vm902_vm6, %v920_v30, %v919_v23 }
 0x254   : > { %v798_v2 = vpop.xlane.xlu2 %797  ;;  %v875_v25 = vunpack.c.l.b16 %v834_v20  ;;  %v876_v32 = vunpack.c.h.b16 %v834_v20 }
 0x255   : > { %v838_v33 = vpack.c.bf16 %v800_v41, %v798_v2 }
 0x256   : > { %v922_v36 = vperm.slane %v875_v25, %v1970_v34  ;;  %v924_v45 = vperm.slane %v876_v32, %v1973_v39 }
 0x257   : > { %v883_v46 = vunpack.c.l.b16 %v838_v33 }
 0x258   : > { %v923_v47 = vsel %vm906_vm7, %v922_v36, %v921_v44 }
 0x259   : > { %v796_v3 = vpop.xlane.xlu1 %795  ;;  %v812_v4 = vpop.xlane.xlu0 %811  ;;  %v925_v58 = vsel %vm910_vm8, %v924_v45, %v923_v47  ;;  %v936_v61 = vperm.slane %v883_v46, %v1970_v34 }
 0x25a   : > { %v837_v26 = vpack.c.bf16 %v796_v3, %v794_v59  ;;  %v884_v59 = vunpack.c.h.b16 %v838_v33  ;;  %v962_v14 = vsel %vm545_vm4, %v925_v58, %v1990_v0 }
 0x25c   : > { %v810_v8 = vpop.xlane.xlu2 %809  ;;  %v881_v37 = vunpack.c.l.b16 %v837_v26  ;;  %v882_v38 = vunpack.c.h.b16 %v837_v26 }
 0x25d   : > { %v841_v50 = vpack.c.bf16 %v812_v4, %v810_v8 }
 0x25e   : > { %v933_v48 = vperm.slane %v881_v37, %v1964_v22  ;;  %v934_v49 = vperm.slane %v882_v38, %v1967_v31 }
 0x25f   : > { %v889_v62 = vunpack.c.l.b16 %v841_v50  ;;  %v890_v63 = vunpack.c.h.b16 %v841_v50 }
 0x260   : > { %v935_v41 = vsel %vm902_vm6, %v934_v49, %v933_v48 }
 0x261   : > { %v814_v9 = vpop.xlane.xlu1 %813  ;;  %v788_v12 = vpop.xlane.xlu0 %787  ;;  %v937_v15 = vsel %vm906_vm7, %v936_v61, %v935_v41  ;;  %v947_v20 = vperm.slane %v889_v62, %v1964_v22  ;;  %v948_v25 = vperm.slane %v890_v63, %v1967_v31 }
 0x264   : > { %v816_v10 = vpop.xlane.xlu2 %815 }
 0x265   : > { %v842_v56 = vpack.c.bf16 %v816_v10, %v814_v9 }
 0x267   : > { %v891_v8 = vunpack.c.l.b16 %v842_v56  ;;  %v892_v26 = vunpack.c.h.b16 %v842_v56  ;;  %v1446_v56 = vld [vmem:[%s2164_s7 + $0x10] sm:$0xff] }
 0x269   : > { %v790_v13 = vpop.xlane.xlu1 %789  ;;  %v806_v19 = vpop.xlane.xlu0 %805  ;;  %v952_v44 = vperm.slane %v892_v26, %v1973_v39 }
 0x26c   : > { %v786_v18 = vpop.xlane.xlu2 %785 }
 0x26d   : > { %v835_v29 = vpack.c.bf16 %v788_v12, %v786_v18  ;;  %v938_v12 = vperm.slane %v884_v59, %v1973_v39  ;;  %v1444_v59 = vld [vmem:[%s2164_s7] sm:$0xff] }
 0x26f   : > { %v877_v40 = vunpack.c.l.b16 %v835_v29  ;;  %v878_v42 = vunpack.c.h.b16 %v835_v29  ;;  %v939_v38 = vsel %vm910_vm8, %v938_v12, %v937_v15 }
 0x271   : > { %v802_v27 = vpop.xlane.xlu1 %801  ;;  %v926_v52 = vperm.slane %v877_v40, %v1964_v22  ;;  %v927_v28 = vperm.slane %v878_v42, %v1967_v31  ;;  %v818_v53 = vpop.xlane.xlu0 %817 }
 0x273   : > { %v928_v2 = vsel %vm902_vm6, %v927_v28, %v926_v52 }
 0x274   : > { %v792_v35 = vpop.xlane.xlu2 %791 }
 0x275   : > { %v836_v7 = vpack.c.bf16 %v792_v35, %v790_v13 }
 0x277   : > { %v879_v43 = vunpack.c.l.b16 %v836_v7  ;;  %v880_v54 = vunpack.c.h.b16 %v836_v7 }
 0x279   : > { %v808_v51 = vpop.xlane.xlu1 %807  ;;  %v929_v57 = vperm.slane %v879_v43, %v1970_v34  ;;  %v931_v3 = vperm.slane %v880_v54, %v1973_v39  ;;  %v824_v23 = vpop.xlane.xlu0 %823  ;;  %v949_v43 = vsel %vm902_vm6, %v948_v25, %v947_v20 }
 0x27a   : > { %v840_v55 = vpack.c.bf16 %v808_v51, %v806_v19 }
 0x27b   : > { %v930_v9 = vsel %vm906_vm7, %v929_v57, %v928_v2  ;;  %v1022_v57 = vpop.f32.mrf.mxu3 }
 0x27c   : > { %v804_v60 = vpop.xlane.xlu2 %803  ;;  %v887_v4 = vunpack.c.l.b16 %v840_v55  ;;  %v888_v13 = vunpack.c.h.b16 %v840_v55  ;;  %v932_v21 = vsel %vm910_vm8, %v931_v3, %v930_v9 }
 0x27d   : > { %v839_v1 = vpack.c.bf16 %v804_v60, %v802_v27  ;;  %v950_v27 = vperm.slane %v891_v8, %v1970_v34  ;;  %v963_v36 = vsel %vm549_vm5, %v932_v21, %v962_v14  ;;  %v1584_v60 = vld [vmem:[%s2163_s6] ss:$0 sm:$0xff] }
 0x27e   : > { %v943_v24 = vperm.slane %v887_v4, %v1970_v34  ;;  %v945_v29 = vperm.slane %v888_v13, %v1973_v39  ;;  %v965_v49 = vsel %vm964_vm9, %v939_v38, %v963_v36  ;;  %v1585_v4 = vld [vmem:[%s2165_s8] ss:$0 sm:$0xff] }
 0x27f   : > { %v885_v10 = vunpack.c.l.b16 %v839_v1  ;;  %v886_v11 = vunpack.c.h.b16 %v839_v1  ;;  %v951_v47 = vsel %vm906_vm7, %v950_v27, %v949_v43 }
 0x281   : > { %v940_v16 = vperm.slane %v885_v10, %v1964_v22  ;;  %v941_v17 = vperm.slane %v886_v11, %v1967_v31  ;;  %v820_v18 = vpop.xlane.xlu1 %819 }
 0x282   : > { %v843_v19 = vpack.c.bf16 %v820_v18, %v818_v53 }
 0x283   : > { %v942_v0 = vsel %vm902_vm6, %v941_v17, %v940_v16  ;;  %v1024_v58 = vpop.f32.mrf.mxu3 }
 0x284   : > { %v944_v30 = vsel %vm906_vm7, %v943_v24, %v942_v0  ;;  %v893_v32 = vunpack.c.l.b16 %v843_v19  ;;  %v894_v33 = vunpack.c.h.b16 %v843_v19  ;;  %v822_v35 = vpop.xlane.xlu2 %821 }
 0x285   : > { %v844_v37 = vpack.c.bf16 %v824_v23, %v822_v35  ;;  %v946_v42 = vsel %vm910_vm8, %v945_v29, %v944_v30 }
 0x286   : > { %v954_v7 = vperm.slane %v893_v32, %v1964_v22  ;;  %v955_v40 = vperm.slane %v894_v33, %v1967_v31  ;;  %v967_v51 = vsel %vm966_vm10, %v946_v42, %v965_v49  ;;  %v953_v31 = vsel %vm910_vm8, %v952_v44, %v951_v47 }
 0x287   : > { %v895_v45 = vunpack.c.l.b16 %v844_v37  ;;  %v896_v46 = vunpack.c.h.b16 %v844_v37  ;;  %v969_v53 = vsel %vm968_vm11, %v953_v31, %v967_v51 }
 0x288   : > { %v956_v48 = vsel %vm902_vm6, %v955_v40, %v954_v7 }
 0x289   : > { %v957_v50 = vperm.slane %v895_v45, %v1970_v34  ;;  %v959_v22 = vperm.slane %v896_v46, %v1973_v39  ;;  %v1447_v34 = vld [vmem:[%s2164_s7 + $0x18] sm:$0xff]  ;;  %v1445_v39 = vld [vmem:[%s2164_s7 + $0x8] sm:$0xff] }
 0x28a   : > { %1059 = vmatpush.bf16.msrb.mxu0 %v1447_v34  ;;  %1087 = vmatpush.bf16.msrb.mxu1 %v1445_v39 }
 0x28b   : > { %v958_v52 = vsel %vm906_vm7, %v957_v50, %v956_v48 }
 0x28c   : > { %v960_v28 = vsel %vm910_vm8, %v959_v22, %v958_v52 }
 0x28d   : > { %v971_v54 = vsel %vm970_vm12, %v960_v28, %v969_v53 }
 0x28e   : > { %v972_v55 = vpack.c.b16 %v971_v54, %v971_v54  ;;  %1060 = vmatpush.bf16.msrb.mxu0 %v1446_v56  ;;  %1088 = vmatpush.bf16.msrb.mxu1 %v1444_v59 }
 0x290   : > { %1389 = vmatmul.msk.bf16.vlgmr.msra.gmra.mxu2 %vm473_vm1, %v972_v55 }
 0x291   : > { %1407 = vmatmul.msk.bf16.vlgmr.msrb.gmra.mxu0 %vm473_vm1, %v1878_v6 }
 0x30e   : > { %v1062_v6 = vpop.f32.mrf.mxu0 }
 0x313   : > { %v997_v61 = vpop.f32.mrf.mxu2 }
 0x314   : > { %v1023_v62 = vadd.f32 %v1022_v57, %v997_v61 }
 0x316   : > { %v1030_v63 = vadd.f32 %v1584_v60, %v1023_v62  ;;  %v1064_v3 = vpop.f32.mrf.mxu0 }
 0x318   : > { %v1031_v1 = vmax.f32 %v1030_v63, 0.0 }
 0x31a   : > { %v1032_v41 = vpack.c.bf16 %v1031_v1, %v1031_v1 }
 0x31b   : > { %v999_v2 = vpop.f32.mrf.mxu2 }
 0x31c   : > { %1416 = vmatmul.msk.bf16.vlgmr.msrb.gmra.mxu1 %vm473_vm1, %v1032_v41 }
 0x399   : > { %v1090_v8 = vpop.f32.mrf.mxu1 }
 0x39a   : > { %v1091_v9 = vadd.f32 %v1090_v8, %v1062_v6 }
 0x39c   : > { %v1098_v10 = vadd.f32 %v1585_v4, %v1091_v9 }
 0x39e   : > { %1119 = vrot.lane.b32.xlu1 %v1098_v10, %s1725_s25  ;;  %v1417_v12 = vmul.f32 -1.442695, %v1098_v10 }
 0x3a0   : > { %1590 = vpow2.f32 %v1417_v12 }
 0x3a1   : > { %v1092_v11 = vpop.f32.mrf.mxu1 }
 0x3a6   : > { %v1591_v13 = vpop.eup %1590 }
 0x3a7   : > { %v1102_v14 = vadd.f32 1.0, %v1591_v13 }
 0x3a9   : > { %1592 = vrcp.f32 %v1102_v14  ;;  %v1114_v21 = vand.u32 2147483648, %v1102_v14  ;;  %vm1108_vm14 = vweird.f32 %v1102_v14  ;;  %v1112_v24 = vand.u32 2147483647, %v1102_v14 }
 0x3ab   : > { %v1115_v25 = vor.u32 1.1754944e-38, %v1114_v21  ;;  %vm1113_vm0 = vcmp.eq.f32.partialorder %v1112_v24, 8.507059e+37 }
 0x3af   : > { %v1593_v15 = vpop.eup %1592 }
 0x3b0   : > { %v1104_v16 = vmul.f32 %v1593_v15, %v1102_v14  ;;  %vm1109_vm13 = vweird.f32 %v1593_v15 }
 0x3b1   : > { %vm1110_vm15 = vmor %vm1108_vm14, %vm1109_vm13 }
 0x3b2   : > { %v1105_v17 = vsub.f32 1.0, %v1104_v16 }
 0x3b4   : > { %v1106_v18 = vmul.f32 %v1593_v15, %v1105_v17 }
 0x3b6   : > { %v1107_v20 = vadd.f32 %v1593_v15, %v1106_v18 }
 0x3b8   : > { %v1111_v19 = vsel %vm1110_vm15, %v1593_v15, %v1107_v20 }
 0x3b9   : > { %v1116_v27 = vsel %vm1113_vm0, %v1115_v25, %v1111_v19 }
 0x3ba   : > { %v1129_v33 = vsub.f32 1.0, %v1116_v27 }
 0x410   : > { %v1120_v26 = vpop.permute.xlu1 %1119 }
 0x411   : > { %v1122_v0 = vmul.f32 %v1120_v26, %v1116_v27 }
 0x413   : > { %1124 = vrot.lane.b32.xlu2 %v1122_v0, %s1726_s26 }
 0x41b   : > { %1136 = vrot.lane.b32.xlu2 %v1874_v5, %s1725_s25 }
 0x46d   : > { %v1125_v29 = vpop.permute.xlu2 %1124 }
 0x46e   : > { %v1127_v23 = vadd.f32 %v1125_v29, %v1098_v10 }
 0x470   : > { %1594 = vtanh.f32 %v1127_v23 }
 0x475   : > { %v1137_v32 = vpop.permute.xlu2 %1136 }
 0x476   : > { %v1595_v30 = vpop.eup %1594  ;;  %v1139_v36 = vmul.f32 %v1137_v32, %v1116_v27 }
 0x477   : > { %1131 = vrot.lane.b32.xlu0 %v1595_v30, %s1727_s27 }
 0x4e9   : > { %v1132_v35 = vpop.permute.xlu0 %1131 }
 0x4ea   : > { %v1134_v37 = vmul.f32 %v1132_v35, %v1129_v33 }
 0x4ec   : > { %v1140_v38 = vadd.f32 %v1139_v36, %v1134_v37 }
 0x4ee   : > { %1142 = vrot.lane.b32.xlu1 %v1140_v38, %s1727_s27 }
 0x55d   : > { %1149 = sbr.rel (%p1418_p12) target bundleno = 1379 (0x563), region = 72 }
 0x560   : > { %v1143_v7 = vpop.permute.xlu1 %1142 }
 0x561   : > { %1145 = vst.msk [vmem:[#allocation2] sm:$0xff] %vm473_vm1, %v1143_v7 }
 0x562   : > { %1150 = vst.msk [vmem:[#allocation5] sm:$0xff] %vm473_vm1, %v1143_v7 }
 0x563 PF: > { %v1151_v5 = vpack.c.bf16 %v1140_v38, %v1140_v38  ;;  %v1449_v40 = vld [vmem:[%s2166_s9 + $0x8] sm:$0xff]  ;;  %v1448_v42 = vld [vmem:[%s2166_s9] sm:$0xff]  ;;  %s1728_s23 = smov [#allocation5]   ;;  %s1430_s14 = sshll.u32 %s1818_s29, 3 }
 0x564   : > { %1184 = vmatpush.bf16.msrb.mxu2 %v1449_v40  ;;  %v1596_v44 = vld [vmem:[%s2167_s10] ss:$0 sm:$0xff]  ;;  %s1233_s24 = sshll.u32 %s1728_s23, 4  ;;  %s1219_s16 = scalar_lea.hbm %s2168_s11, %s1430_s14  ;;  %s1234_s24 = int_to_ptr.vmem [resolvable:$true] %s1233_s24 }
 0x565   : > { %1161 = vrot.lane.b32.xlu0 %v1151_v5, %s1727_s27  ;;  %s1235_s27 = sshll.u32 %s2169_s12, 4  ;;  %s1245_s23 = scalar_lea.hbm %s2170_s13, %s1430_s14  ;;  %s1236_s27 = int_to_ptr.hbm [resolvable:$true] %s1235_s27 }
 0x566   : > { %1531 = dma.vmem_to_hbm [thread:$0]  (%p282_p2), %s1234_s24, 128, %s1236_s27, [#allocation6]  }
 0x567   : > { %s1203_s30 = sand.u32 1, %s1818_s29   ;;  %s2187_s25 = scalar_lea.vmem [#allocation3], %s1850_s21 }
 0x568   : > { %1185 = vmatpush.bf16.msrb.mxu2 %v1448_v42  ;;  %s1221_s26 = sshll.u32 %s2187_s25, 4  ;;  %s1223_s0 = sshll.u32 %s1219_s16, 4  ;;  %s1222_s26 = int_to_ptr.vmem [resolvable:$true] %s1221_s26  ;;  %s1224_s0 = int_to_ptr.hbm [resolvable:$true] %s1223_s0 }
 0x569   : > { %s2188_s24 = scalar_lea.vmem [#allocation7], %s1850_s21  ;;  %s1249_s1 = sshll.u32 %s1245_s23, 4  ;;  %s2107_s1 = int_to_ptr.hbm [resolvable:$true] %s1249_s1 }
 0x56a   : > { %s2104_s27 = sshll.u32 %s2188_s24, 4  ;;  %s2189_s17 = smov %s2187_s25  ;;  %s1248_s27 = int_to_ptr.vmem [resolvable:$true] %s2104_s27 }
 0x56b   : > { %s1204_s14 = scalar_lea.sflag [#allocation4], %s1203_s30  ;;  %s1643_s15 = sshra.s32 %s1224_s0, 4  ;;  %s1644_s15 = int_to_ptr.hbm [resolvable:$true] %s1643_s15 }
 0x56c   : > { %s1645_s20 = scalar_lea.hbm %s1644_s15, 8  ;;  %s1649_s23 = scalar_lea.hbm %s2168_s11, 48 }
 0x56d   : > { %p1646_p13 = scmp.ne.s32.totalorder %s1644_s15, %s1645_s20  ;;  %p1650_p3 = scmp.lt.s32.totalorder %s1644_s15, %s2168_s11 }
 0x56e   : > { %p1651_p4 = scmp.lt.s32.totalorder %s1649_s23, %s1645_s20 }
 0x56f   : > { %p1647_p0 = pnand %p1646_p13, %p1838_p5 }
 0x570   : > { %p1652_p7 = por %p1651_p4, %p1650_p3 }
 0x571   : > { %p1648_p1 = pneg %p1647_p0 }
 0x573   : > { %p1653_p8 = pnand %p1652_p7, %p1648_p1 }
 0x5d7   : > { %v1162_v43 = vpop.permute.xlu0 %1161 }
 0x5d8   : > { %1427 = vmatmul.msk.bf16.vlgmr.msrb.gmra.mxu2 %vm473_vm1, %v1162_v43 }
 0x65b   : > { %v1187_v45 = vpop.f32.mrf.mxu2 }
 0x65c   : > { %v1188_v46 = vadd.f32 %v1596_v44, %v1187_v45 }
 0x65e   : > { %1191 = vmax.xlane.f32.xlu0 %v1188_v46 }
 0x663   : > { %v1189_v47 = vpop.f32.mrf.mxu2 }
 0x6d1   : > { %v1192_v48 = vpop.xlane.xlu0 %1191 }
 0x6d2   : > { %v1193_v49 = vsub.f32 %v1188_v46, %v1192_v48 }
 0x6d4   : > { %v1194_v50 = vmul.f32 1.442695, %v1193_v49 }
 0x6d6   : > { %1597 = vpow2.f32 %v1194_v50 }
 0x6dc   : > { %v1598_v22 = vpop.eup %1597 }
 0x6dd   : > { %1196 = vadd.xlane.f32.xlu1 %v1598_v22 }
 0x750   : > { %v1197_v51 = vpop.xlane.xlu1 %1196 }
 0x751   : > { %1599 = vlog2.f32 %v1197_v51 }
 0x757   : > { %v1600_v31 = vpop.eup %1599 }
 0x758   : > { %v1199_v52 = vmul.f32 0.6931472, %v1600_v31 }
 0x75a   : > { %v1200_v28 = vadd.f32 %v1199_v52, %v1192_v48 }
 0x75c   : > { %v1201_v53 = vsub.f32 %v1188_v46, %v1200_v28 }
 0x75e   : > { %1202 = vst [vmem:[%s2189_s17] sm:$0xff] %v1201_v53 }
 0x75f   : > { %1656 = shalt.err (!%p1653_p8)
}
 0x760   : > { %1529 = dma.vmem_to_hbm [thread:$0]  (%p1838_p5), %s1222_s26, 128, %s1224_s0, %s1204_s14  }
 0x761   : > { %s1671_s30 = sshra.s32 %s2107_s1, 4  ;;  %s1677_s15 = scalar_lea.hbm %s2170_s13, 48  ;;  %s1672_s30 = int_to_ptr.hbm [resolvable:$true] %s1671_s30 }
 0x762   : > { %s1673_s21 = scalar_lea.hbm %s1672_s30, 8  ;;  %p1678_p12 = scmp.lt.s32.totalorder %s1672_s30, %s2170_s13 }
 0x763   : > { %p1674_p9 = scmp.ne.s32.totalorder %s1672_s30, %s1673_s21  ;;  %p1679_p13 = scmp.lt.s32.totalorder %s1677_s15, %s1673_s21 }
 0x765   : > { %p1675_p10 = pnand %p1674_p9, %p1838_p5  ;;  %p1680_p0 = por %p1679_p13, %p1678_p12 }
 0x767   : > { %p1676_p11 = pneg %p1675_p10 }
 0x769   : > { %p1681_p1 = pnand %p1680_p0, %p1676_p11 }
 0x76b   : > { %1684 = shalt.err (!%p1681_p1)
}
 0x76c   : > { %1532 = dma.vmem_to_hbm [thread:$0]  (%p1838_p5), %s1248_s27, 128, %s2107_s1, %s1204_s14  }
 0x76d   : > { %1702 = dma.done.wait (%p282_p2), [#allocation6], 128  }
 0x76e   : > { %1704 = vsyncadd (%p282_p2), [#allocation6], 4294967168 }
 0x76f PF: > { %p1546_p3 = scmp.ge.s32.totalorder %s1723_s28, 2  ;;  %s2190_s0 = sadd.s32 4294967294, %s1723_s28  }
 0x770   : > { %s1266_s26 = sand.u32 1, %s2190_s0  }
 0x771   : > { %p1538_p4 = pnand %p1546_p3, %p1842_p6  ;;  %s1267_s18 = scalar_lea.sflag [#allocation4], %s1266_s26 }
 0x773   : > { %p1539_p7 = pneg %p1538_p4 }
 0x775   : > { %1706 = dma.done.wait (%p1539_p7), %s1267_s18, 256  }
 0x776   : > { %1708 = vsyncadd (%p1539_p7), %s1267_s18, 4294967040  ;;  %s2191_s28 = sld [smem:[#allocation12_spill]] }
 0x777   : > { %s2192_s25 = sld [smem:[#allocation10_spill]] }
 0x778   : > { %s2193_s26 = sld [smem:[#allocation11_spill]] }
 0x779   : > { %s2194_s27 = sld [smem:[#allocation13_spill]] }
 0x77c   : > { %p25_p5 = scmp.ge.s32.totalorder %s2191_s28, 8  }
 0x77e   :  { %27 = sbr.rel (!%p25_p5) target bundleno = 7 (0x7), region = 130 }
 0x783   :  { %1283 = vsyncpa [#allocation4], 1 }
 0x784   :  { %1285 = vsyncpa [#allocation4 + $0x1], 1 }
 0x785   :  { %1286 = vsyncpa [#allocation6], 1 }

</bundles_post_ra>
